<compile_context>
chip_gen: v7x
topology: tpu7x:2x2x1
jax: 0.10.0
libtpu: 0.0.40
codegen_flags: <defaults>
</compile_context>

<pallas_src>
import functools

import jax
import jax.numpy as jnp
from jax import lax
from jax.experimental import pallas as pl
from jax.experimental.pallas import tpu as pltpu

NEG_SLOPE = 0.01  # nn.LeakyReLU default negative_slope


def _leaky_relu(y):
    return jnp.where(y > 0, y, NEG_SLOPE * y)


def _pick_tile(n, target):
    """Largest divisor of n that is <= target and a multiple of 128, else n.

    Guarantees exact grid coverage (no silently dropped tail) and satisfies the
    TPU lane constraint (last block dim multiple of 128 or full extent).
    """
    if n <= target:
        return n
    t = (target // 128) * 128
    while t >= 128:
        if n % t == 0:
            return t
        t -= 128
    return n


# ----------------------------------------------------------------------------
# Kernel 1: 1x1 conv + bias + LeakyReLU in channels-first layout
#   Y[:, hw_tile] = leaky(W @ X[:, hw_tile] + b)
# ----------------------------------------------------------------------------
def _conv1x1_lrelu_kernel(x_ref, w_ref, b_ref, o_ref):
    # x_ref: (1, Cin, T)   w_ref: (Cout, Cin)   b_ref: (Cout, 1)
    y = jnp.dot(w_ref[...], x_ref[0], preferred_element_type=jnp.float32)
    o_ref[0] = _leaky_relu(y + b_ref[...]).astype(o_ref.dtype)


def conv1x1_lrelu(x_cf, w, b, *, spatial_tile=1024):
    """1x1 conv + LeakyReLU.  x_cf: (B, Cin, HW) channels-first."""
    B, Cin, HW = x_cf.shape
    Cout = w.shape[0]
    T = _pick_tile(HW, spatial_tile)
    assert HW % T == 0
    return pl.pallas_call(
        _conv1x1_lrelu_kernel,
        out_shape=jax.ShapeDtypeStruct((B, Cout, HW), jnp.float32),
        grid=(B, HW // T),
        in_specs=[
            pl.BlockSpec((1, Cin, T), lambda b, t: (b, 0, t)),
            pl.BlockSpec((Cout, Cin), lambda b, t: (0, 0)),
            pl.BlockSpec((Cout, 1), lambda b, t: (0, 0)),
        ],
        out_specs=pl.BlockSpec((1, Cout, T), lambda b, t: (b, 0, t)),
        compiler_params=pltpu.CompilerParams(
            dimension_semantics=("parallel", "parallel")),
    )(x_cf, w, b)


# ----------------------------------------------------------------------------
# Kernel 2 (pass 1 of attention): per-column logsumexp of A = S @ S^T.
#   torch nn.Softmax(dim=1) on (B, HW, HW) normalizes over the FIRST HW axis,
#   i.e. per column.  Column stats are accumulated online over row tiles with
#   axis-0 reductions so they land directly in the (1, T) layout pass 2 needs.
# ----------------------------------------------------------------------------
def _attn_lse_kernel(sp_ref, sq_ref, lse_ref, m_sc, l_sc):
    pi = pl.program_id(2)

    @pl.when(pi == 0)
    def _():
        m_sc[...] = jnp.full_like(m_sc, -jnp.inf)
        l_sc[...] = jnp.zeros_like(l_sc)

    # (Tp, Cp) x (Tq, Cp) -> (Tp, Tq) block of A, bf16 inputs, f32 accumulate.
    a = lax.dot_general(sp_ref[0], sq_ref[0], (((1,), (1,)), ((), ())),
                        preferred_element_type=jnp.float32)
    m_new = jnp.maximum(m_sc[...], jnp.max(a, axis=0, keepdims=True))  # (1, Tq)
    alpha = jnp.exp(m_sc[...] - m_new)
    l_sc[...] = alpha * l_sc[...] + jnp.sum(jnp.exp(a - m_new), axis=0,
                                            keepdims=True)
    m_sc[...] = m_new

    @pl.when(pi == pl.num_programs(2) - 1)
    def _():
        lse_ref[0] = m_sc[...] + jnp.log(l_sc[...])


# ----------------------------------------------------------------------------
# Kernel 3 (pass 2 of attention): O = exp(A - lse) @ S, accumulated over
# column tiles.  The softmax denominator is folded into lse, so there is no
# HW^2 divide and no separate reciprocal at all.
# ----------------------------------------------------------------------------
def _attn_out_kernel(sp_ref, sk_ref, lse_ref, o_ref, acc_sc, *, C):
    ki = pl.program_id(2)

    @pl.when(ki == 0)
    def _():
        acc_sc[...] = jnp.zeros_like(acc_sc)

    a = lax.dot_general(sp_ref[0], sk_ref[0], (((1,), (1,)), ((), ())),
                        preferred_element_type=jnp.float32)     # (Tp, Tk)
    p = jnp.exp(a - lse_ref[0])                                 # P[p,k] <= 1
    acc_sc[...] += jnp.dot(p.astype(jnp.bfloat16), sk_ref[0],
                           preferred_element_type=jnp.float32)

    @pl.when(ki == pl.num_programs(2) - 1)
    def _():
        acc = acc_sc[...]
        o_ref[0] = acc[:, :C].astype(o_ref.dtype)   # drop channel padding


def spatial_attention(s_bpc, *, tile_target=512):
    """O = softmax(S @ S^T, dim=1) @ S per batch item, tiled two-pass."""
    BB, HW, C = s_bpc.shape
    Cp = 128 * pl.cdiv(C, 128)                  # lane-pad the channel axis
    s = s_bpc if Cp == C else jnp.pad(s_bpc, ((0, 0), (0, 0), (0, Cp - C)))
    s = s.astype(jnp.bfloat16)                  # bf16 MXU inputs, f32 accum

    T = _pick_tile(HW, tile_target)
    assert HW % T == 0
    n_t = HW // T

    cost1 = pl.CostEstimate(
        flops=2 * BB * HW * HW * Cp,
        transcendentals=BB * HW * HW,
        bytes_accessed=2 * BB * HW * Cp * (1 + n_t) + 4 * BB * HW)
    lse = pl.pallas_call(
        _attn_lse_kernel,
        out_shape=jax.ShapeDtypeStruct((BB, 1, HW), jnp.float32),
        grid=(BB, n_t, n_t),
        in_specs=[
            pl.BlockSpec((1, T, Cp), lambda b, q, p: (b, p, 0)),   # scanned rows
            pl.BlockSpec((1, T, Cp), lambda b, q, p: (b, q, 0)),   # stat columns
        ],
        out_specs=pl.BlockSpec((1, 1, T), lambda b, q, p: (b, 0, q)),
        scratch_shapes=[pltpu.VMEM((1, T), jnp.float32),
                        pltpu.VMEM((1, T), jnp.float32)],
        compiler_params=pltpu.CompilerParams(
            dimension_semantics=("parallel", "parallel", "arbitrary")),
        cost_estimate=cost1,
    )(s, s)

    cost2 = pl.CostEstimate(
        flops=4 * BB * HW * HW * Cp,
        transcendentals=BB * HW * HW,
        bytes_accessed=(2 * BB * HW * Cp * (1 + n_t)
                        + 4 * BB * HW * n_t + 4 * BB * HW * C))
    out = pl.pallas_call(
        functools.partial(_attn_out_kernel, C=C),
        out_shape=jax.ShapeDtypeStruct((BB, HW, C), jnp.float32),
        grid=(BB, n_t, n_t),
        in_specs=[
            pl.BlockSpec((1, T, Cp), lambda b, p, k: (b, p, 0)),   # out rows
            pl.BlockSpec((1, T, Cp), lambda b, p, k: (b, k, 0)),   # contraction
            pl.BlockSpec((1, 1, T), lambda b, p, k: (b, 0, k)),    # lse
        ],
        out_specs=pl.BlockSpec((1, T, C), lambda b, p, k: (b, p, 0)),
        scratch_shapes=[pltpu.VMEM((T, Cp), jnp.float32)],
        compiler_params=pltpu.CompilerParams(
            dimension_semantics=("parallel", "parallel", "arbitrary")),
        cost_estimate=cost2,
    )(s, s, lse)
    return out


# ----------------------------------------------------------------------------
# Kernel 4: fused tail — residual add + conv2 (SPA & SPE) + concat + fusion conv
# ----------------------------------------------------------------------------
def _tail_kernel(x_ref, aspa_ref, aspe_ref, w2a_ref, b2a_ref, w2e_ref, b2e_ref,
                 woa_ref, wob_ref, bo_ref, o_ref):
    x = x_ref[0]                                               # (C, T)
    spa = _leaky_relu(
        jnp.dot(w2a_ref[...], x + aspa_ref[0],
                preferred_element_type=jnp.float32) + b2a_ref[...])
    spe = _leaky_relu(
        jnp.dot(w2e_ref[...], x + aspe_ref[0],
                preferred_element_type=jnp.float32) + b2e_ref[...])
    y = (jnp.dot(woa_ref[...], spa, preferred_element_type=jnp.float32)
         + jnp.dot(wob_ref[...], spe, preferred_element_type=jnp.float32)
         + bo_ref[...])
    o_ref[0] = _leaky_relu(y).astype(o_ref.dtype)


def fused_tail(x_cf, att_cf, params, *, spatial_tile=1024):
    """x_cf: (B, C, HW) feature; att_cf: (2B, C, HW) — [:B]=SPA, [B:]=SPE."""
    B, C, HW = x_cf.shape
    Cout = params["w_out"].shape[0]
    T = _pick_tile(HW, spatial_tile)
    assert HW % T == 0
    w_out_a = params["w_out"][:, :C]     # applied to the SPA half of the cat
    w_out_b = params["w_out"][:, C:]     # applied to the SPE half

    def wspec(shape):
        return pl.BlockSpec(shape, lambda b, t: (0, 0))

    return pl.pallas_call(
        _tail_kernel,
        out_shape=jax.ShapeDtypeStruct((B, Cout, HW), jnp.float32),
        grid=(B, HW // T),
        in_specs=[
            pl.BlockSpec((1, C, T), lambda b, t: (b, 0, t)),       # feature
            pl.BlockSpec((1, C, T), lambda b, t: (b, 0, t)),       # attn SPA
            pl.BlockSpec((1, C, T), lambda b, t: (b + B, 0, t)),   # attn SPE
            wspec((C, C)), wspec((C, 1)),
            wspec((C, C)), wspec((C, 1)),
            wspec((Cout, C)), wspec((Cout, C)), wspec((Cout, 1)),
        ],
        out_specs=pl.BlockSpec((1, Cout, T), lambda b, t: (b, 0, t)),
        compiler_params=pltpu.CompilerParams(
            dimension_semantics=("parallel", "parallel")),
    )(x_cf, att_cf, att_cf,
      params["spa_w2"], params["spa_b2"],
      params["spe_w2"], params["spe_b2"],
      w_out_a, w_out_b, params["b_out"])


# ----------------------------------------------------------------------------
# Full forward (layout glue is all free reshapes of contiguous NCHW data)
# ----------------------------------------------------------------------------
def self_attention_forward(x, params):
    """SelfAttention.forward: SPA branch + SPE branch + fusion conv."""
    B, C, H, W = x.shape
    HW = H * W
    x_cf = x.reshape(B, C, HW)                       # free reinterpretation

    # conv1 of the SPA branch (channels-first 1x1 conv + LeakyReLU).
    fc_cf = conv1x1_lrelu(x_cf, params["spa_w1"], params["spa_b1"])

    # torch.reshape((B, HW, C)) views of contiguous NCHW buffers (free).
    s_spa = fc_cf.reshape(B, HW, C)
    s_spe = x_cf.reshape(B, HW, C)
    s_all = jnp.concatenate([s_spa, s_spe], axis=0)  # (2B, HW, C), single pass

    o_all = spatial_attention(s_all)                 # (2B, HW, C)
    att_cf = o_all.reshape(2 * B, C, HW)             # torch.reshape back (free)

    out_cf = fused_tail(x_cf, att_cf, params)
    Cout = params["w_out"].shape[0]
    return out_cf.reshape(B, Cout, H, W)


# ----------------------------------------------------------------------------
# Pure-JAX reference (mirrors the PyTorch module) for correctness check
# ----------------------------------------------------------------------------
def ref_forward(x, params):
    B, C, H, W = x.shape
    HW = H * W

    def conv_lrelu(z, w, b):  # z NCHW, w (Cout, Cin), b (Cout, 1)
        y = jnp.einsum("oi,bihw->bohw", w, z) + b.reshape(1, -1, 1, 1)
        return jnp.where(y > 0, y, NEG_SLOPE * y)

    def attn_block(src):
        s = src.reshape(B, HW, C)
        a = jnp.einsum("bpc,bqc->bpq", s, s)
        p = jax.nn.softmax(a, axis=1)                # torch nn.Softmax(dim=1)
        o = jnp.einsum("bpq,bqc->bpc", p, s)
        return o.reshape(B, C, H, W)

    fc = conv_lrelu(x, params["spa_w1"], params["spa_b1"])
    spa = conv_lrelu(x + attn_block(fc), params["spa_w2"], params["spa_b2"])
    spe = conv_lrelu(x + attn_block(x), params["spe_w2"], params["spe_b2"])
    cat = jnp.concatenate([spa, spe], axis=1)
    return conv_lrelu(cat, params["w_out"], params["b_out"])


# ----------------------------------------------------------------------------
if __name__ == "__main__":
    B, C, H, W = 2, 8, 8, 8          # small demo shapes (module default C=120)
    Cout = C

    key = jax.random.PRNGKey(0)
    ks = jax.random.split(key, 10)
    sc = 0.1
    # 1x1 conv weights stored as (Cout, Cin) == torch weight[:, :, 0, 0].
    params = {
        "spa_w1": sc * jax.random.normal(ks[0], (C, C), jnp.float32),
        "spa_b1": sc * jax.random.normal(ks[1], (C, 1), jnp.float32),
        "spa_w2": sc * jax.random.normal(ks[2], (C, C), jnp.float32),
        "spa_b2": sc * jax.random.normal(ks[3], (C, 1), jnp.float32),
        "spe_w2": sc * jax.random.normal(ks[4], (C, C), jnp.float32),
        "spe_b2": sc * jax.random.normal(ks[5], (C, 1), jnp.float32),
        "w_out":  sc * jax.random.normal(ks[6], (Cout, 2 * C), jnp.float32),
        "b_out":  sc * jax.random.normal(ks[7], (Cout, 1), jnp.float32),
    }
    x = jax.random.normal(ks[8], (B, C, H, W), jnp.float32)

    out = jax.jit(self_attention_forward)(x, params)
    out = jax.block_until_ready(out)

    ref = ref_forward(x, params)
    assert out.shape == (B, Cout, H, W), out.shape
    # bf16 MXU inputs in the attention -> slightly looser tolerance than pure f32.
    assert jnp.allclose(out, ref, atol=2e-2, rtol=2e-2), float(
        jnp.max(jnp.abs(out - ref)))

    print("KERNEL_OK")
</pallas_src>

<mosaic_0001>
module attributes {stable_mosaic.version = 11 : i64} {
  func.func @_conv1x1_lrelu_kernel(%arg0: i32, %arg1: i32, %arg2: memref<1x8x64xf32, #tpu.memory_space<vmem>>, %arg3: memref<8x8xf32, #tpu.memory_space<vmem>>, %arg4: memref<8x1xf32, #tpu.memory_space<vmem>>, %arg5: memref<1x8x64xf32, #tpu.memory_space<vmem>>) attributes {dimension_semantics = [#tpu.dimension_semantics<parallel>, #tpu.dimension_semantics<parallel>], iteration_bounds = array<i64: 2, 1>, scalar_prefetch = 0 : i64, scratch_operands = 0 : i64, tpu.core_type = #tpu.core_type<tc>, window_params = [{transform_indices = @transform_0, window_bounds = array<i64: 1, 8, 64>}, {pipeline_mode = #tpu.pipeline_mode<synchronous>, transform_indices = @transform_1, window_bounds = array<i64: 8, 8>}, {pipeline_mode = #tpu.pipeline_mode<synchronous>, transform_indices = @transform_2, window_bounds = array<i64: 8, 1>}, {transform_indices = @transform_3, window_bounds = array<i64: 1, 8, 64>}]} {
    %c0 = arith.constant 0 : index
    %c0_0 = arith.constant 0 : index
    %0 = vector.load %arg3[%c0, %c0_0] : memref<8x8xf32, #tpu.memory_space<vmem>>, vector<8x8xf32>
    %c0_1 = arith.constant 0 : index
    %c0_2 = arith.constant 0 : index
    %c0_3 = arith.constant 0 : index
    %1 = vector.load %arg2[%c0_1, %c0_2, %c0_3] : memref<1x8x64xf32, #tpu.memory_space<vmem>>, vector<1x8x64xf32>
    %2 = vector.shape_cast %1 : vector<1x8x64xf32> to vector<8x64xf32>
    %cst = arith.constant dense<0.000000e+00> : vector<8x64xf32>
    %3 = tpu.matmul %0, %2, %cst {dimension_numbers = #tpu.dot_dimension_numbers<[1], [0], [0], [1], [0, 0, 1, 1], [], []>} : vector<8x8xf32>, vector<8x64xf32>, vector<8x64xf32> -> vector<8x64xf32>
    %c0_4 = arith.constant 0 : index
    %c0_5 = arith.constant 0 : index
    %4 = vector.load %arg4[%c0_4, %c0_5] : memref<8x1xf32, #tpu.memory_space<vmem>>, vector<8x1xf32>
    %5 = vector.broadcast %4 : vector<8x1xf32> to vector<8x64xf32>
    %6 = arith.addf %3, %5 : vector<8x64xf32>
    %cst_6 = arith.constant 0.000000e+00 : f32
    %7 = vector.broadcast %cst_6 : f32 to vector<8x64xf32>
    %8 = arith.cmpf ogt, %6, %7 : vector<8x64xf32>
    %cst_7 = arith.constant 0.00999999977 : f32
    %9 = vector.broadcast %cst_7 : f32 to vector<8x64xf32>
    %10 = arith.mulf %9, %6 : vector<8x64xf32>
    %11 = arith.select %8, %6, %10 : vector<8x64xi1>, vector<8x64xf32>
    %c0_8 = arith.constant 0 : index
    %c0_9 = arith.constant 0 : index
    %c0_10 = arith.constant 0 : index
    %12 = vector.load %arg5[%c0_8, %c0_9, %c0_10] : memref<1x8x64xf32, #tpu.memory_space<vmem>>, vector<1x8x64xf32>
    %13 = vector.shape_cast %12 : vector<1x8x64xf32> to vector<8x64xf32>
    %14 = vector.shape_cast %11 : vector<8x64xf32> to vector<1x8x64xf32>
    tpu.vector_store %arg5[%c0_8, %c0_9, %c0_10], %14 {strides = array<i32>} : memref<1x8x64xf32, #tpu.memory_space<vmem>>, vector<1x8x64xf32>,
    return
  }
  func.func @transform_0(%arg0: i32, %arg1: i32) -> (i32, i32, i32) {
    %c0_i32 = arith.constant 0 : i32
    %c0_i32_0 = arith.constant 0 : i32
    return %arg0, %c0_i32, %arg1 : i32, i32, i32
  }
  func.func @transform_1(%arg0: i32, %arg1: i32) -> (i32, i32) {
    %c0_i32 = arith.constant 0 : i32
    %c0_i32_0 = arith.constant 0 : i32
    %c0_i32_1 = arith.constant 0 : i32
    return %c0_i32, %c0_i32_0 : i32, i32
  }
  func.func @transform_2(%arg0: i32, %arg1: i32) -> (i32, i32) {
    %c0_i32 = arith.constant 0 : i32
    %c0_i32_0 = arith.constant 0 : i32
    %c0_i32_1 = arith.constant 0 : i32
    return %c0_i32, %c0_i32_0 : i32, i32
  }
  func.func @transform_3(%arg0: i32, %arg1: i32) -> (i32, i32, i32) {
    %c0_i32 = arith.constant 0 : i32
    %c0_i32_0 = arith.constant 0 : i32
    return %arg0, %c0_i32, %arg1 : i32, i32, i32
  }
}

module attributes {stable_mosaic.version = 11 : i64} {
  func.func @_attn_out_kernel(%arg0: i32, %arg1: i32, %arg2: i32, %arg3: memref<1x64x128xbf16, #tpu.memory_space<vmem>>, %arg4: memref<1x64x128xbf16, #tpu.memory_space<vmem>>, %arg5: memref<1x1x64xf32, #tpu.memory_space<vmem>>, %arg6: memref<1x64x8xf32, #tpu.memory_space<vmem>>, %arg7: memref<64x128xf32, #tpu.memory_space<vmem>>) attributes {dimension_semantics = [#tpu.dimension_semantics<parallel>, #tpu.dimension_semantics<parallel>, #tpu.dimension_semantics<arbitrary>], iteration_bounds = array<i64: 4, 1, 1>, scalar_prefetch = 0 : i64, scratch_operands = 1 : i64, tpu.core_type = #tpu.core_type<tc>, window_params = [{transform_indices = @transform_0, window_bounds = array<i64: 1, 64, 128>}, {transform_indices = @transform_1, window_bounds = array<i64: 1, 64, 128>}, {transform_indices = @transform_2, window_bounds = array<i64: 1, 1, 64>}, {transform_indices = @transform_3, window_bounds = array<i64: 1, 64, 8>}]} {
    %c0_i32 = arith.constant 0 : i32
    %0 = arith.cmpi eq, %arg2, %c0_i32 : i32
    %1 = arith.extui %0 : i1 to i32
    %c0_i32_0 = arith.constant 0 : i32
    %2 = arith.cmpi ne, %1, %c0_i32_0 : i32
    scf.if %2 {
      %cst_19 = arith.constant 0.000000e+00 : f32
      %23 = vector.broadcast %cst_19 : f32 to vector<64x128xf32>
      %c0_20 = arith.constant 0 : index
      %c0_21 = arith.constant 0 : index
      %24 = vector.load %arg7[%c0_20, %c0_21] : memref<64x128xf32, #tpu.memory_space<vmem>>, vector<64x128xf32>
      tpu.vector_store %arg7[%c0_20, %c0_21], %23 {strides = array<i32>} : memref<64x128xf32, #tpu.memory_space<vmem>>, vector<64x128xf32>,
    } else {
    }
    %c0 = arith.constant 0 : index
    %c0_1 = arith.constant 0 : index
    %c0_2 = arith.constant 0 : index
    %3 = vector.load %arg3[%c0, %c0_1, %c0_2] : memref<1x64x128xbf16, #tpu.memory_space<vmem>>, vector<1x64x128xbf16>
    %4 = vector.shape_cast %3 : vector<1x64x128xbf16> to vector<64x128xbf16>
    %c0_3 = arith.constant 0 : index
    %c0_4 = arith.constant 0 : index
    %c0_5 = arith.constant 0 : index
    %5 = vector.load %arg4[%c0_3, %c0_4, %c0_5] : memref<1x64x128xbf16, #tpu.memory_space<vmem>>, vector<1x64x128xbf16>
    %6 = vector.shape_cast %5 : vector<1x64x128xbf16> to vector<64x128xbf16>
    %cst = arith.constant dense<0.000000e+00> : vector<64x64xf32>
    %7 = tpu.matmul %4, %6, %cst {dimension_numbers = #tpu.dot_dimension_numbers<[1], [1], [0], [0], [0, 0, 1, 0], [], []>} : vector<64x128xbf16>, vector<64x128xbf16>, vector<64x64xf32> -> vector<64x64xf32>
    %c0_6 = arith.constant 0 : index
    %c0_7 = arith.constant 0 : index
    %c0_8 = arith.constant 0 : index
    %8 = vector.load %arg5[%c0_6, %c0_7, %c0_8] : memref<1x1x64xf32, #tpu.memory_space<vmem>>, vector<1x1x64xf32>
    %9 = vector.shape_cast %8 : vector<1x1x64xf32> to vector<1x64xf32>
    %10 = vector.broadcast %9 : vector<1x64xf32> to vector<64x64xf32>
    %11 = arith.subf %7, %10 : vector<64x64xf32>
    %12 = math.exp %11 : vector<64x64xf32>
    %c0_9 = arith.constant 0 : index
    %c0_10 = arith.constant 0 : index
    %13 = vector.load %arg7[%c0_9, %c0_10] : memref<64x128xf32, #tpu.memory_space<vmem>>, vector<64x128xf32>
    %14 = arith.truncf %12 : vector<64x64xf32> to vector<64x64xbf16>
    %c0_11 = arith.constant 0 : index
    %c0_12 = arith.constant 0 : index
    %c0_13 = arith.constant 0 : index
    %15 = vector.load %arg4[%c0_11, %c0_12, %c0_13] : memref<1x64x128xbf16, #tpu.memory_space<vmem>>, vector<1x64x128xbf16>
    %16 = vector.shape_cast %15 : vector<1x64x128xbf16> to vector<64x128xbf16>
    %cst_14 = arith.constant dense<0.000000e+00> : vector<64x128xf32>
    %17 = tpu.matmul %14, %16, %cst_14 {dimension_numbers = #tpu.dot_dimension_numbers<[1], [0], [0], [1], [0, 0, 1, 1], [], []>} : vector<64x64xbf16>, vector<64x128xbf16>, vector<64x128xf32> -> vector<64x128xf32>
    %18 = arith.addf %13, %17 : vector<64x128xf32>
    %c0_15 = arith.constant 0 : index
    %c0_16 = arith.constant 0 : index
    %19 = vector.load %arg7[%c0_15, %c0_16] : memref<64x128xf32, #tpu.memory_space<vmem>>, vector<64x128xf32>
    tpu.vector_store %arg7[%c0_15, %c0_16], %18 {strides = array<i32>} : memref<64x128xf32, #tpu.memory_space<vmem>>, vector<64x128xf32>,
    %c0_i32_17 = arith.constant 0 : i32
    %20 = arith.cmpi eq, %arg2, %c0_i32_17 : i32
    %21 = arith.extui %20 : i1 to i32
    %c0_i32_18 = arith.constant 0 : i32
    %22 = arith.cmpi ne, %21, %c0_i32_18 : i32
    scf.if %22 {
      %c0_19 = arith.constant 0 : index
      %c0_20 = arith.constant 0 : index
      %23 = vector.load %arg7[%c0_19, %c0_20] : memref<64x128xf32, #tpu.memory_space<vmem>>, vector<64x128xf32>
      %24 = vector.extract_strided_slice %23 {offsets = [0, 0], sizes = [64, 8], strides = [1, 1]} : vector<64x128xf32> to vector<64x8xf32>
      %c0_21 = arith.constant 0 : index
      %c0_22 = arith.constant 0 : index
      %c0_23 = arith.constant 0 : index
      %25 = vector.load %arg6[%c0_21, %c0_22, %c0_23] : memref<1x64x8xf32, #tpu.memory_space<vmem>>, vector<1x64x8xf32>
      %26 = vector.shape_cast %25 : vector<1x64x8xf32> to vector<64x8xf32>
      %27 = vector.shape_cast %24 : vector<64x8xf32> to vector<1x64x8xf32>
      tpu.vector_store %arg6[%c0_21, %c0_22, %c0_23], %27 {strides = array<i32>} : memref<1x64x8xf32, #tpu.memory_space<vmem>>, vector<1x64x8xf32>,
    } else {
    }
    return
  }
  func.func @transform_0(%arg0: i32, %arg1: i32, %arg2: i32) -> (i32, i32, i32) {
    %c0_i32 = arith.constant 0 : i32
    %c0_i32_0 = arith.constant 0 : i32
    return %arg0, %arg1, %c0_i32 : i32, i32, i32
  }
  func.func @transform_1(%arg0: i32, %arg1: i32, %arg2: i32) -> (i32, i32, i32) {
    %c0_i32 = arith.constant 0 : i32
    %c0_i32_0 = arith.constant 0 : i32
    return %arg0, %arg2, %c0_i32 : i32, i32, i32
  }
  func.func @transform_2(%arg0: i32, %arg1: i32, %arg2: i32) -> (i32, i32, i32) {
    %c0_i32 = arith.constant 0 : i32
    %c0_i32_0 = arith.constant 0 : i32
    return %arg0, %c0_i32, %arg2 : i32, i32, i32
  }
  func.func @transform_3(%arg0: i32, %arg1: i32, %arg2: i32) -> (i32, i32, i32) {
    %c0_i32 = arith.constant 0 : i32
    %c0_i32_0 = arith.constant 0 : i32
    return %arg0, %arg1, %c0_i32 : i32, i32, i32
  }
}

module attributes {stable_mosaic.version = 11 : i64} {
  func.func @_attn_lse_kernel(%arg0: i32, %arg1: i32, %arg2: i32, %arg3: memref<1x64x128xbf16, #tpu.memory_space<vmem>>, %arg4: memref<1x64x128xbf16, #tpu.memory_space<vmem>>, %arg5: memref<1x1x64xf32, #tpu.memory_space<vmem>>, %arg6: memref<1x64xf32, #tpu.memory_space<vmem>>, %arg7: memref<1x64xf32, #tpu.memory_space<vmem>>) attributes {dimension_semantics = [#tpu.dimension_semantics<parallel>, #tpu.dimension_semantics<parallel>, #tpu.dimension_semantics<arbitrary>], iteration_bounds = array<i64: 4, 1, 1>, scalar_prefetch = 0 : i64, scratch_operands = 2 : i64, tpu.core_type = #tpu.core_type<tc>, window_params = [{transform_indices = @transform_0, window_bounds = array<i64: 1, 64, 128>}, {transform_indices = @transform_1, window_bounds = array<i64: 1, 64, 128>}, {transform_indices = @transform_2, window_bounds = array<i64: 1, 1, 64>}]} {
    %c0_i32 = arith.constant 0 : i32
    %0 = arith.cmpi eq, %arg2, %c0_i32 : i32
    %1 = arith.extui %0 : i1 to i32
    %c0_i32_0 = arith.constant 0 : i32
    %2 = arith.cmpi ne, %1, %c0_i32_0 : i32
    scf.if %2 {
      %cst_20 = arith.constant 0xFF800000 : f32
      %28 = vector.broadcast %cst_20 : f32 to vector<1x64xf32>
      %c0_21 = arith.constant 0 : index
      %c0_22 = arith.constant 0 : index
      %29 = vector.load %arg6[%c0_21, %c0_22] : memref<1x64xf32, #tpu.memory_space<vmem>>, vector<1x64xf32>
      tpu.vector_store %arg6[%c0_21, %c0_22], %28 {strides = array<i32>} : memref<1x64xf32, #tpu.memory_space<vmem>>, vector<1x64xf32>,
      %cst_23 = arith.constant 0.000000e+00 : f32
      %30 = vector.broadcast %cst_23 : f32 to vector<1x64xf32>
      %c0_24 = arith.constant 0 : index
      %c0_25 = arith.constant 0 : index
      %31 = vector.load %arg7[%c0_24, %c0_25] : memref<1x64xf32, #tpu.memory_space<vmem>>, vector<1x64xf32>
      tpu.vector_store %arg7[%c0_24, %c0_25], %30 {strides = array<i32>} : memref<1x64xf32, #tpu.memory_space<vmem>>, vector<1x64xf32>,
    } else {
    }
    %c0 = arith.constant 0 : index
    %c0_1 = arith.constant 0 : index
    %c0_2 = arith.constant 0 : index
    %3 = vector.load %arg3[%c0, %c0_1, %c0_2] : memref<1x64x128xbf16, #tpu.memory_space<vmem>>, vector<1x64x128xbf16>
    %4 = vector.shape_cast %3 : vector<1x64x128xbf16> to vector<64x128xbf16>
    %c0_3 = arith.constant 0 : index
    %c0_4 = arith.constant 0 : index
    %c0_5 = arith.constant 0 : index
    %5 = vector.load %arg4[%c0_3, %c0_4, %c0_5] : memref<1x64x128xbf16, #tpu.memory_space<vmem>>, vector<1x64x128xbf16>
    %6 = vector.shape_cast %5 : vector<1x64x128xbf16> to vector<64x128xbf16>
    %cst = arith.constant dense<0.000000e+00> : vector<64x64xf32>
    %7 = tpu.matmul %4, %6, %cst {dimension_numbers = #tpu.dot_dimension_numbers<[1], [1], [0], [0], [0, 0, 1, 0], [], []>} : vector<64x128xbf16>, vector<64x128xbf16>, vector<64x64xf32> -> vector<64x64xf32>
    %c0_6 = arith.constant 0 : index
    %c0_7 = arith.constant 0 : index
    %8 = vector.load %arg6[%c0_6, %c0_7] : memref<1x64xf32, #tpu.memory_space<vmem>>, vector<1x64xf32>
    %cst_8 = arith.constant dense<0xFF800000> : vector<64xf32>
    %9 = vector.multi_reduction <maximumf>, %7, %cst_8 [0] : vector<64x64xf32> to vector<64xf32>
    %10 = vector.shape_cast %9 : vector<64xf32> to vector<1x64xf32>
    %11 = arith.maximumf %8, %10 : vector<1x64xf32>
    %c0_9 = arith.constant 0 : index
    %c0_10 = arith.constant 0 : index
    %12 = vector.load %arg6[%c0_9, %c0_10] : memref<1x64xf32, #tpu.memory_space<vmem>>, vector<1x64xf32>
    %13 = arith.subf %12, %11 : vector<1x64xf32>
    %14 = math.exp %13 : vector<1x64xf32>
    %c0_11 = arith.constant 0 : index
    %c0_12 = arith.constant 0 : index
    %15 = vector.load %arg7[%c0_11, %c0_12] : memref<1x64xf32, #tpu.memory_space<vmem>>, vector<1x64xf32>
    %16 = arith.mulf %14, %15 : vector<1x64xf32>
    %17 = vector.broadcast %11 : vector<1x64xf32> to vector<64x64xf32>
    %18 = arith.subf %7, %17 : vector<64x64xf32>
    %19 = math.exp %18 : vector<64x64xf32>
    %cst_13 = arith.constant dense<0.000000e+00> : vector<64xf32>
    %20 = vector.multi_reduction <add>, %19, %cst_13 [0] : vector<64x64xf32> to vector<64xf32>
    %21 = vector.shape_cast %20 : vector<64xf32> to vector<1x64xf32>
    %22 = arith.addf %16, %21 : vector<1x64xf32>
    %c0_14 = arith.constant 0 : index
    %c0_15 = arith.constant 0 : index
    %23 = vector.load %arg7[%c0_14, %c0_15] : memref<1x64xf32, #tpu.memory_space<vmem>>, vector<1x64xf32>
    tpu.vector_store %arg7[%c0_14, %c0_15], %22 {strides = array<i32>} : memref<1x64xf32, #tpu.memory_space<vmem>>, vector<1x64xf32>,
    %c0_16 = arith.constant 0 : index
    %c0_17 = arith.constant 0 : index
    %24 = vector.load %arg6[%c0_16, %c0_17] : memref<1x64xf32, #tpu.memory_space<vmem>>, vector<1x64xf32>
    tpu.vector_store %arg6[%c0_16, %c0_17], %11 {strides = array<i32>} : memref<1x64xf32, #tpu.memory_space<vmem>>, vector<1x64xf32>,
    %c0_i32_18 = arith.constant 0 : i32
    %25 = arith.cmpi eq, %arg2, %c0_i32_18 : i32
    %26 = arith.extui %25 : i1 to i32
    %c0_i32_19 = arith.constant 0 : i32
    %27 = arith.cmpi ne, %26, %c0_i32_19 : i32
    scf.if %27 {
      %c0_20 = arith.constant 0 : index
      %c0_21 = arith.constant 0 : index
      %28 = vector.load %arg6[%c0_20, %c0_21] : memref<1x64xf32, #tpu.memory_space<vmem>>, vector<1x64xf32>
      %c0_22 = arith.constant 0 : index
      %c0_23 = arith.constant 0 : index
      %29 = vector.load %arg7[%c0_22, %c0_23] : memref<1x64xf32, #tpu.memory_space<vmem>>, vector<1x64xf32>
      %30 = math.log %29 : vector<1x64xf32>
      %31 = arith.addf %28, %30 : vector<1x64xf32>
      %c0_24 = arith.constant 0 : index
      %c0_25 = arith.constant 0 : index
      %c0_26 = arith.constant 0 : index
      %32 = vector.load %arg5[%c0_24, %c0_25, %c0_26] : memref<1x1x64xf32, #tpu.memory_space<vmem>>, vector<1x1x64xf32>
      %33 = vector.shape_cast %32 : vector<1x1x64xf32> to vector<1x64xf32>
      %34 = vector.shape_cast %31 : vector<1x64xf32> to vector<1x1x64xf32>
      tpu.vector_store %arg5[%c0_24, %c0_25, %c0_26], %34 {strides = array<i32>} : memref<1x1x64xf32, #tpu.memory_space<vmem>>, vector<1x1x64xf32>,
    } else {
    }
    return
  }
  func.func @transform_0(%arg0: i32, %arg1: i32, %arg2: i32) -> (i32, i32, i32) {
    %c0_i32 = arith.constant 0 : i32
    %c0_i32_0 = arith.constant 0 : i32
    return %arg0, %arg2, %c0_i32 : i32, i32, i32
  }
  func.func @transform_1(%arg0: i32, %arg1: i32, %arg2: i32) -> (i32, i32, i32) {
    %c0_i32 = arith.constant 0 : i32
    %c0_i32_0 = arith.constant 0 : i32
    return %arg0, %arg1, %c0_i32 : i32, i32, i32
  }
  func.func @transform_2(%arg0: i32, %arg1: i32, %arg2: i32) -> (i32, i32, i32) {
    %c0_i32 = arith.constant 0 : i32
    %c0_i32_0 = arith.constant 0 : i32
    return %arg0, %c0_i32, %arg1 : i32, i32, i32
  }
}

module attributes {stable_mosaic.version = 11 : i64} {
  func.func @_tail_kernel(%arg0: i32, %arg1: i32, %arg2: memref<1x8x64xf32, #tpu.memory_space<vmem>>, %arg3: memref<1x8x64xf32, #tpu.memory_space<vmem>>, %arg4: memref<1x8x64xf32, #tpu.memory_space<vmem>>, %arg5: memref<8x8xf32, #tpu.memory_space<vmem>>, %arg6: memref<8x1xf32, #tpu.memory_space<vmem>>, %arg7: memref<8x8xf32, #tpu.memory_space<vmem>>, %arg8: memref<8x1xf32, #tpu.memory_space<vmem>>, %arg9: memref<8x8xf32, #tpu.memory_space<vmem>>, %arg10: memref<8x8xf32, #tpu.memory_space<vmem>>, %arg11: memref<8x1xf32, #tpu.memory_space<vmem>>, %arg12: memref<1x8x64xf32, #tpu.memory_space<vmem>>) attributes {dimension_semantics = [#tpu.dimension_semantics<parallel>, #tpu.dimension_semantics<parallel>], iteration_bounds = array<i64: 2, 1>, scalar_prefetch = 0 : i64, scratch_operands = 0 : i64, tpu.core_type = #tpu.core_type<tc>, window_params = [{transform_indices = @transform_0, window_bounds = array<i64: 1, 8, 64>}, {transform_indices = @transform_1, window_bounds = array<i64: 1, 8, 64>}, {transform_indices = @transform_2, window_bounds = array<i64: 1, 8, 64>}, {pipeline_mode = #tpu.pipeline_mode<synchronous>, transform_indices = @transform_3, window_bounds = array<i64: 8, 8>}, {pipeline_mode = #tpu.pipeline_mode<synchronous>, transform_indices = @transform_4, window_bounds = array<i64: 8, 1>}, {pipeline_mode = #tpu.pipeline_mode<synchronous>, transform_indices = @transform_5, window_bounds = array<i64: 8, 8>}, {pipeline_mode = #tpu.pipeline_mode<synchronous>, transform_indices = @transform_6, window_bounds = array<i64: 8, 1>}, {pipeline_mode = #tpu.pipeline_mode<synchronous>, transform_indices = @transform_7, window_bounds = array<i64: 8, 8>}, {pipeline_mode = #tpu.pipeline_mode<synchronous>, transform_indices = @transform_8, window_bounds = array<i64: 8, 8>}, {pipeline_mode = #tpu.pipeline_mode<synchronous>, transform_indices = @transform_9, window_bounds = array<i64: 8, 1>}, {transform_indices = @transform_10, window_bounds = array<i64: 1, 8, 64>}]} {
    %c0 = arith.constant 0 : index
    %c0_0 = arith.constant 0 : index
    %c0_1 = arith.constant 0 : index
    %0 = vector.load %arg2[%c0, %c0_0, %c0_1] : memref<1x8x64xf32, #tpu.memory_space<vmem>>, vector<1x8x64xf32>
    %1 = vector.shape_cast %0 : vector<1x8x64xf32> to vector<8x64xf32>
    %c0_2 = arith.constant 0 : index
    %c0_3 = arith.constant 0 : index
    %2 = vector.load %arg5[%c0_2, %c0_3] : memref<8x8xf32, #tpu.memory_space<vmem>>, vector<8x8xf32>
    %c0_4 = arith.constant 0 : index
    %c0_5 = arith.constant 0 : index
    %c0_6 = arith.constant 0 : index
    %3 = vector.load %arg3[%c0_4, %c0_5, %c0_6] : memref<1x8x64xf32, #tpu.memory_space<vmem>>, vector<1x8x64xf32>
    %4 = vector.shape_cast %3 : vector<1x8x64xf32> to vector<8x64xf32>
    %5 = arith.addf %1, %4 : vector<8x64xf32>
    %cst = arith.constant dense<0.000000e+00> : vector<8x64xf32>
    %6 = tpu.matmul %2, %5, %cst {dimension_numbers = #tpu.dot_dimension_numbers<[1], [0], [0], [1], [0, 0, 1, 1], [], []>} : vector<8x8xf32>, vector<8x64xf32>, vector<8x64xf32> -> vector<8x64xf32>
    %c0_7 = arith.constant 0 : index
    %c0_8 = arith.constant 0 : index
    %7 = vector.load %arg6[%c0_7, %c0_8] : memref<8x1xf32, #tpu.memory_space<vmem>>, vector<8x1xf32>
    %8 = vector.broadcast %7 : vector<8x1xf32> to vector<8x64xf32>
    %9 = arith.addf %6, %8 : vector<8x64xf32>
    %cst_9 = arith.constant 0.000000e+00 : f32
    %10 = vector.broadcast %cst_9 : f32 to vector<8x64xf32>
    %11 = arith.cmpf ogt, %9, %10 : vector<8x64xf32>
    %cst_10 = arith.constant 0.00999999977 : f32
    %12 = vector.broadcast %cst_10 : f32 to vector<8x64xf32>
    %13 = arith.mulf %12, %9 : vector<8x64xf32>
    %14 = arith.select %11, %9, %13 : vector<8x64xi1>, vector<8x64xf32>
    %c0_11 = arith.constant 0 : index
    %c0_12 = arith.constant 0 : index
    %15 = vector.load %arg7[%c0_11, %c0_12] : memref<8x8xf32, #tpu.memory_space<vmem>>, vector<8x8xf32>
    %c0_13 = arith.constant 0 : index
    %c0_14 = arith.constant 0 : index
    %c0_15 = arith.constant 0 : index
    %16 = vector.load %arg4[%c0_13, %c0_14, %c0_15] : memref<1x8x64xf32, #tpu.memory_space<vmem>>, vector<1x8x64xf32>
    %17 = vector.shape_cast %16 : vector<1x8x64xf32> to vector<8x64xf32>
    %18 = arith.addf %1, %17 : vector<8x64xf32>
    %cst_16 = arith.constant dense<0.000000e+00> : vector<8x64xf32>
    %19 = tpu.matmul %15, %18, %cst_16 {dimension_numbers = #tpu.dot_dimension_numbers<[1], [0], [0], [1], [0, 0, 1, 1], [], []>} : vector<8x8xf32>, vector<8x64xf32>, vector<8x64xf32> -> vector<8x64xf32>
    %c0_17 = arith.constant 0 : index
    %c0_18 = arith.constant 0 : index
    %20 = vector.load %arg8[%c0_17, %c0_18] : memref<8x1xf32, #tpu.memory_space<vmem>>, vector<8x1xf32>
    %21 = vector.broadcast %20 : vector<8x1xf32> to vector<8x64xf32>
    %22 = arith.addf %19, %21 : vector<8x64xf32>
    %cst_19 = arith.constant 0.000000e+00 : f32
    %23 = vector.broadcast %cst_19 : f32 to vector<8x64xf32>
    %24 = arith.cmpf ogt, %22, %23 : vector<8x64xf32>
    %cst_20 = arith.constant 0.00999999977 : f32
    %25 = vector.broadcast %cst_20 : f32 to vector<8x64xf32>
    %26 = arith.mulf %25, %22 : vector<8x64xf32>
    %27 = arith.select %24, %22, %26 : vector<8x64xi1>, vector<8x64xf32>
    %c0_21 = arith.constant 0 : index
    %c0_22 = arith.constant 0 : index
    %28 = vector.load %arg9[%c0_21, %c0_22] : memref<8x8xf32, #tpu.memory_space<vmem>>, vector<8x8xf32>
    %cst_23 = arith.constant dense<0.000000e+00> : vector<8x64xf32>
    %29 = tpu.matmul %28, %14, %cst_23 {dimension_numbers = #tpu.dot_dimension_numbers<[1], [0], [0], [1], [0, 0, 1, 1], [], []>} : vector<8x8xf32>, vector<8x64xf32>, vector<8x64xf32> -> vector<8x64xf32>
    %c0_24 = arith.constant 0 : index
    %c0_25 = arith.constant 0 : index
    %30 = vector.load %arg10[%c0_24, %c0_25] : memref<8x8xf32, #tpu.memory_space<vmem>>, vector<8x8xf32>
    %cst_26 = arith.constant dense<0.000000e+00> : vector<8x64xf32>
    %31 = tpu.matmul %30, %27, %cst_26 {dimension_numbers = #tpu.dot_dimension_numbers<[1], [0], [0], [1], [0, 0, 1, 1], [], []>} : vector<8x8xf32>, vector<8x64xf32>, vector<8x64xf32> -> vector<8x64xf32>
    %32 = arith.addf %29, %31 : vector<8x64xf32>
    %c0_27 = arith.constant 0 : index
    %c0_28 = arith.constant 0 : index
    %33 = vector.load %arg11[%c0_27, %c0_28] : memref<8x1xf32, #tpu.memory_space<vmem>>, vector<8x1xf32>
    %34 = vector.broadcast %33 : vector<8x1xf32> to vector<8x64xf32>
    %35 = arith.addf %32, %34 : vector<8x64xf32>
    %cst_29 = arith.constant 0.000000e+00 : f32
    %36 = vector.broadcast %cst_29 : f32 to vector<8x64xf32>
    %37 = arith.cmpf ogt, %35, %36 : vector<8x64xf32>
    %cst_30 = arith.constant 0.00999999977 : f32
    %38 = vector.broadcast %cst_30 : f32 to vector<8x64xf32>
    %39 = arith.mulf %38, %35 : vector<8x64xf32>
    %40 = arith.select %37, %35, %39 : vector<8x64xi1>, vector<8x64xf32>
    %c0_31 = arith.constant 0 : index
    %c0_32 = arith.constant 0 : index
    %c0_33 = arith.constant 0 : index
    %41 = vector.load %arg12[%c0_31, %c0_32, %c0_33] : memref<1x8x64xf32, #tpu.memory_space<vmem>>, vector<1x8x64xf32>
    %42 = vector.shape_cast %41 : vector<1x8x64xf32> to vector<8x64xf32>
    %43 = vector.shape_cast %40 : vector<8x64xf32> to vector<1x8x64xf32>
    tpu.vector_store %arg12[%c0_31, %c0_32, %c0_33], %43 {strides = array<i32>} : memref<1x8x64xf32, #tpu.memory_space<vmem>>, vector<1x8x64xf32>,
    return
  }
  func.func @transform_0(%arg0: i32, %arg1: i32) -> (i32, i32, i32) {
    %c0_i32 = arith.constant 0 : i32
    %c0_i32_0 = arith.constant 0 : i32
    return %arg0, %c0_i32, %arg1 : i32, i32, i32
  }
  func.func @transform_1(%arg0: i32, %arg1: i32) -> (i32, i32, i32) {
    %c0_i32 = arith.constant 0 : i32
    %c0_i32_0 = arith.constant 0 : i32
    return %arg0, %c0_i32, %arg1 : i32, i32, i32
  }
  func.func @transform_2(%arg0: i32, %arg1: i32) -> (i32, i32, i32) {
    %c2_i32 = arith.constant 2 : i32
    %0 = arith.addi %arg0, %c2_i32 : i32
    %c0_i32 = arith.constant 0 : i32
    %c0_i32_0 = arith.constant 0 : i32
    return %0, %c0_i32, %arg1 : i32, i32, i32
  }
  func.func @transform_3(%arg0: i32, %arg1: i32) -> (i32, i32) {
    %c0_i32 = arith.constant 0 : i32
    %c0_i32_0 = arith.constant 0 : i32
    %c0_i32_1 = arith.constant 0 : i32
    return %c0_i32, %c0_i32_0 : i32, i32
  }
  func.func @transform_4(%arg0: i32, %arg1: i32) -> (i32, i32) {
    %c0_i32 = arith.constant 0 : i32
    %c0_i32_0 = arith.constant 0 : i32
    %c0_i32_1 = arith.constant 0 : i32
    return %c0_i32, %c0_i32_0 : i32, i32
  }
  func.func @transform_5(%arg0: i32, %arg1: i32) -> (i32, i32) {
    %c0_i32 = arith.constant 0 : i32
    %c0_i32_0 = arith.constant 0 : i32
    %c0_i32_1 = arith.constant 0 : i32
    return %c0_i32, %c0_i32_0 : i32, i32
  }
  func.func @transform_6(%arg0: i32, %arg1: i32) -> (i32, i32) {
    %c0_i32 = arith.constant 0 : i32
    %c0_i32_0 = arith.constant 0 : i32
    %c0_i32_1 = arith.constant 0 : i32
    return %c0_i32, %c0_i32_0 : i32, i32
  }
  func.func @transform_7(%arg0: i32, %arg1: i32) -> (i32, i32) {
    %c0_i32 = arith.constant 0 : i32
    %c0_i32_0 = arith.constant 0 : i32
    %c0_i32_1 = arith.constant 0 : i32
    return %c0_i32, %c0_i32_0 : i32, i32
  }
  func.func @transform_8(%arg0: i32, %arg1: i32) -> (i32, i32) {
    %c0_i32 = arith.constant 0 : i32
    %c0_i32_0 = arith.constant 0 : i32
    %c0_i32_1 = arith.constant 0 : i32
    return %c0_i32, %c0_i32_0 : i32, i32
  }
  func.func @transform_9(%arg0: i32, %arg1: i32) -> (i32, i32) {
    %c0_i32 = arith.constant 0 : i32
    %c0_i32_0 = arith.constant 0 : i32
    %c0_i32_1 = arith.constant 0 : i32
    return %c0_i32, %c0_i32_0 : i32, i32
  }
  func.func @transform_10(%arg0: i32, %arg1: i32) -> (i32, i32, i32) {
    %c0_i32 = arith.constant 0 : i32
    %c0_i32_0 = arith.constant 0 : i32
    return %arg0, %c0_i32, %arg1 : i32, i32, i32
  }
}

</mosaic_0001>

<bundles_post_ra>
// kernel: self_attention_forward.4
= control target key start
LH: loop header
LB: loop body
LE: loop exit
PB: predicated region body
PF: predicated region fallthrough
CT: control target
= control target key end

     0   :  { %s450_s12 = smov 0   ;;  %s452_s13 = smov 0   ;;  %s489_s0 = inlined_call_operand.vmem [shape: f32[2,8,64], index: 0, kind: input, shape index: {}]   ;;  %s490_s1 = inlined_call_operand.vmem [shape: f32[8,8], index: 1, kind: input, shape index: {}]   ;;  %s491_s2 = inlined_call_operand.vmem [shape: f32[8,1], index: 2, kind: input, shape index: {}]   ;;  %s492_s3 = inlined_call_operand.vmem [shape: f32[2,8,64], index: 3, kind: output, shape index: {}]  }
   0x1   :  { %s454_s14 = smov 0  }
   0x2 LB: > { %s25_s15 = sadd.s32 1, %s421_s13  ;;  %p362_p0 = scmp.ge.s32.totalorder %s425_s14, 1  ;;  %s425_s14 = sphi %s454_s14, %s13_s14   ;;  %s421_s13 = sphi %s452_s13, %s494_s13   ;;  %s417_s12 = sphi %s450_s12, %s493_s12  }
   0x3   : > { %p27_p1 = scmp.ge.s32.totalorder %s25_s15, 2  ;;  %p155_p2 = scmp.lt.s32.totalorder %s425_s14, 3 }
   0x5   : > { %s496_s15 = smov (%p27_p1, %s25_s15), 0  ;;  %p156_p3 = pnand %p362_p0, %p155_p2 }
   0x6   : > { %p183_p4 = scmp.lt.s32.totalorder (!%p156_p3), %s417_s12, 1  ;;  %v427_v0 = vmov (!%p156_p3), 0.0   ;;  %vm428_vm0 = vmmov (!%p156_p3), 0   ;;  %v199_v1 = vld [vmem:[%s491_s2] sm:$0xff] (!%p156_p3)  ;;  %v429_v2 = vmov (!%p156_p3), 0   ;;  %vm205_vm1 = vcmask (!%p156_p3), 64512  }
   0x7   : > { %159 = sbr.rel (%p156_p3) target bundleno = 237 (0xed), region = 32  ;;  %370 = vmatprep.subr.mxu0 (!%p156_p3), %v427_v0  ;;  %372 = vmatprep.mubr.msk.f32.mxu0 (!%p156_p3), %vm428_vm0, %v427_v0  ;;  %v197_v3 = vld [vmem:[%s490_s1] sm:$0xff] (!%p156_p3)  ;;  %vm282_vm3 = vcmask (!%p156_p3), 523264  }
   0x8   : > { %402 = vset.pattern.permute.xlu0 (!%p156_p3), %v429_v2 }
   0x9   : > { %202 = vperm.xlu0 (!%p156_p3), %402, %v199_v1  }
   0xe   : > { %s498_s12 = smov (!%p183_p4, %s417_s12), 1 }
   0xf   : > { %s363_s18 = sshll.u32 %s498_s12, 3 }
  0x10   : > { %s189_s21 = scalar_lea.vmem %s489_s0, %s363_s18  ;;  %s196_s26 = scalar_lea.vmem %s492_s3, %s363_s18 }
  0x11   : > { %v198_v4 = vld [vmem:[%s189_s21] sm:$0xff] }
  0x12   : > { %371 = vmatpush3.msra.mxu0 %v198_v4 }
  0x13   : > { %373 = vmatmul.mubr.msk.f32.vlgmr.msra.gmra.mrb[0].mxu0 %vm205_vm1, %v197_v3 }
  0x88   : > { %v203_v5 = vpop.permute.xlu0 %202 }
  0xe6   : > { %v275_v6 = vpop.f32.mrb[0].mxu0 }
  0xe7   : > { %v276_v7 = vadd.f32 %v275_v6, %v203_v5  ;;  %v374_v8 = vpop.f32.mrb[1].mxu0 }
  0xe9   : > { %vm279_vm2 = vcmp.gt.f32.partialorder %v276_v7, 0.0  ;;  %v280_v9 = vmul.f32 0.01, %v276_v7 }
  0xeb   : > { %v281_v10 = vsel %vm279_vm2, %v276_v7, %v280_v9 }
  0xec   : > { %283 = vst.msk [vmem:[%s196_s26] sm:$0xff] %vm282_vm3, %v281_v10 }
  0xed PF: > { %s13_s14 = sadd.s32 1, %s425_s14   ;;  %s493_s12 = smov %s421_s13 }
  0xee   : > { %p10_p5 = scmp.ge.s32.totalorder %s13_s14, 4   ;;  %s494_s13 = smov %s496_s15 }
  0xf0   :  { %12 = sbr.rel (!%p10_p5) target bundleno = 2 (0x2), region = 62 }

// kernel: self_attention_forward.6
= control target key start
LH: loop header
LB: loop body
LE: loop exit
PB: predicated region body
PF: predicated region fallthrough
CT: control target
= control target key end

     0   :  { %s866_s12 = smov 0   ;;  %s868_s13 = smov 0   ;;  %s918_s0 = inlined_call_operand.vmem [shape: bf16[4,64,128], index: 0, kind: input, shape index: {}, may-alias: {0,1}]   ;;  %s919_s1 = inlined_call_operand.vmem [shape: bf16[4,64,128], index: 1, kind: input, shape index: {}, may-alias: {0,1}]   ;;  %s920_s2 = inlined_call_operand.vmem [shape: f32[4,1,64], index: 2, kind: input, shape index: {}]   ;;  %s921_s3 = inlined_call_operand.vmem [shape: f32[4,64,8], index: 3, kind: output, shape index: {}]  }
   0x1   :  { %s870_s14 = smov 0  }
   0x2 LB: > { %s32_s15 = sadd.s32 1, %s840_s13  ;;  %p701_p0 = scmp.ge.s32.totalorder %s844_s14, 1  ;;  %s844_s14 = sphi %s870_s14, %s13_s14   ;;  %s840_s13 = sphi %s868_s13, %s923_s13   ;;  %s836_s12 = sphi %s866_s12, %s922_s12  }
   0x3   : > { %p34_p1 = scmp.ge.s32.totalorder %s32_s15, 4  ;;  %p195_p2 = scmp.lt.s32.totalorder %s844_s14, 5 }
   0x5   : > { %s925_s15 = smov (%p34_p1, %s32_s15), 0  ;;  %p196_p3 = pnand %p701_p0, %p195_p2 }
   0x6   : > { %p243_p4 = scmp.lt.s32.totalorder (!%p196_p3), %s836_s12, 3  ;;  %vm463_vm0 = vcmask (!%p196_p3), 523264   ;;  %vm568_vm1 = vcmask (!%p196_p3), 64512  }
   0x7   : > { %199 = sbr.rel (%p196_p3) target bundleno = 507 (0x1fb), region = 32 }
   0xe   : > { %s927_s12 = smov (!%p243_p4, %s836_s12), 3 }
   0xf   : > { %s723_s16 = sshll.u32 %s927_s12, 5  ;;  %s267_s25 = scalar_lea.vmem %s920_s2, %s927_s12 }
  0x10   : > { %s260_s19 = scalar_lea.vmem %s919_s1, %s723_s16  ;;  %s250_s22 = scalar_lea.vmem %s918_s0, %s723_s16  ;;  %v716_v8 = vld [vmem:[%s267_s25] ss:$0 sm:$0xff] }
  0x11   : > { %v798_v0 = vld [vmem:[%s260_s19] sm:$0xff]   ;;  %v799_v1 = vld [vmem:[%s260_s19 + $0x8] sm:$0xff]   ;;  %v800_v3 = vld [vmem:[%s260_s19 + $0x10] sm:$0xff]   ;;  %s725_s26 = sshll.u32 %s927_s12, 6 }
  0x12   : > { %742 = vmatprep.subr.bf16.mxu0 %v798_v0  ;;  %758 = vmatprep.subr.bf16.mxu1 %v798_v0  ;;  %v802_v2 = vld [vmem:[%s250_s22] sm:$0xff]   ;;  %v801_v4 = vld [vmem:[%s260_s19 + $0x18] sm:$0xff]   ;;  %v803_v5 = vld [vmem:[%s250_s22 + $0x8] sm:$0xff]   ;;  %s276_s29 = scalar_lea.vmem %s921_s3, %s725_s26 }
  0x13   : > { %743 = vmatpush3.bf16.xpose.msra.mxu0 %v798_v0  ;;  %759 = vmatpush3.bf16.msra.mxu1 %v798_v0  ;;  %v804_v6 = vld [vmem:[%s250_s22 + $0x10] sm:$0xff]   ;;  %v805_v7 = vld [vmem:[%s250_s22 + $0x18] sm:$0xff]  }
  0x14   : > { %744 = vmatprep.subr.bf16.mxu0 %v799_v1  ;;  %760 = vmatprep.subr.bf16.mxu1 %v799_v1 }
  0x15   : > { %750 = vmatprep.mubr.bf16.mxu0 %v802_v2 }
  0x17   : > { %761 = vmatpush3.bf16.msra.mxu1 %v799_v1 }
  0x18   : > { %762 = vmatprep.subr.bf16.mxu1 %v800_v3 }
  0x1b   : > { %745 = vmatpush3.bf16.xpose.msra.mxu0 %v799_v1  ;;  %763 = vmatpush3.bf16.msra.mxu1 %v800_v3 }
  0x1c   : > { %746 = vmatprep.subr.bf16.mxu0 %v800_v3  ;;  %764 = vmatprep.subr.bf16.mxu1 %v801_v4 }
  0x1f   : > { %765 = vmatpush3.bf16.msra.mxu1 %v801_v4 }
  0x23   : > { %747 = vmatpush3.bf16.xpose.msra.mxu0 %v800_v3 }
  0x24   : > { %748 = vmatprep.subr.bf16.mxu0 %v801_v4 }
  0x2b   : > { %749 = vmatpush3.bf16.xpose.msra.mxu0 %v801_v4 }
  0x32   : > { %751 = vmatmul.mubr.bf16.vlgmr.msra.gmra.mrb[0].mxu0 %v803_v5 }
  0x33   : > { %754 = vmatprep.mubr.bf16.mxu0 %v804_v6 }
  0x3a   : > { %755 = vmatmul.mubr.bf16.gmra.mrb[4].mxu0 %v805_v7 }
 0x105   : > { %v752_v9 = vpop.f32.mrb[0].mxu0 }
 0x106   : > { %v429_v10 = vsub.f32 %v752_v9, %v716_v8  ;;  %v389_v11 = vpop.f32.mrb[1].mxu0 }
 0x107   : > { %v427_v12 = vsub.f32 %v389_v11, %v716_v8  ;;  %v753_v13 = vpop.f32.mrb[2].mxu0 }
 0x108   : > { %v439_v14 = vmul.f32 1.442695, %v429_v10  ;;  %v430_v15 = vsub.f32 %v753_v13, %v716_v8  ;;  %v392_v16 = vpop.f32.mrb[3].mxu0 }
 0x109   : > { %v435_v17 = vmul.f32 1.442695, %v427_v12  ;;  %v428_v18 = vsub.f32 %v392_v16, %v716_v8 }
 0x10a   : > { %806 = vpow2.f32 %v439_v14  ;;  %v441_v19 = vmul.f32 1.442695, %v430_v15 }
 0x10b   : > { %808 = vpow2.f32 %v435_v17  ;;  %v437_v20 = vmul.f32 1.442695, %v428_v18 }
 0x10c   : > { %810 = vpow2.f32 %v441_v19 }
 0x10d   : > { %812 = vpow2.f32 %v437_v20  ;;  %v756_v21 = vpop.f32.mrb[4].mxu0 }
 0x10e   : > { %v433_v22 = vsub.f32 %v756_v21, %v716_v8  ;;  %v405_v23 = vpop.f32.mrb[5].mxu0 }
 0x10f   : > { %v431_v24 = vsub.f32 %v405_v23, %v716_v8  ;;  %v757_v25 = vpop.f32.mrb[6].mxu0 }
 0x110   : > { %v447_v26 = vmul.f32 1.442695, %v433_v22  ;;  %v434_v27 = vsub.f32 %v757_v25, %v716_v8  ;;  %v408_v28 = vpop.f32.mrb[7].mxu0 }
 0x111   : > { %v443_v29 = vmul.f32 1.442695, %v431_v24  ;;  %v432_v30 = vsub.f32 %v408_v28, %v716_v8 }
 0x112   : > { %814 = vpow2.f32 %v447_v26  ;;  %v449_v31 = vmul.f32 1.442695, %v434_v27 }
 0x113   : > { %816 = vpow2.f32 %v443_v29  ;;  %v445_v32 = vmul.f32 1.442695, %v432_v30 }
 0x114   : > { %v807_v33 = vpop.eup %806  ;;  %818 = vpow2.f32 %v449_v31 }
 0x115   : > { %v809_v34 = vpop.eup %808  ;;  %820 = vpow2.f32 %v445_v32 }
 0x116   : > { %v811_v35 = vpop.eup %810 }
 0x117   : > { %v813_v36 = vpop.eup %812  ;;  %v460_v37 = vpack.c.bf16 %v811_v35, %v807_v33 }
 0x118   : > { %v459_v38 = vpack.c.bf16 %v813_v36, %v809_v34 }
 0x11a   : > { %766 = vmatprep.mubr.msk.bf16.mxu1 %vm463_vm0, %v459_v38 }
 0x11b   : > { %767 = vmatmul.mubr.msk.bf16.vlgmr.msra.gmra.mrb[0].mxu1 %vm463_vm0, %v460_v37 }
 0x11c   : > { %v815_v39 = vpop.eup %814 }
 0x11d   : > { %v817_v40 = vpop.eup %816 }
 0x11e   : > { %v819_v41 = vpop.eup %818 }
 0x11f   : > { %v821_v42 = vpop.eup %820  ;;  %v462_v43 = vpack.c.bf16 %v819_v41, %v815_v39 }
 0x120   : > { %v461_v44 = vpack.c.bf16 %v821_v42, %v817_v40 }
 0x122   : > { %770 = vmatprep.mubr.msk.bf16.mxu1 %vm463_vm0, %v461_v44 }
 0x123   : > { %771 = vmatmul.mubr.msk.bf16.gmra.mrb[4].mxu1 %vm463_vm0, %v462_v43 }
 0x1ee   : > { %v768_v45 = vpop.f32.mrb[0].mxu1 }
 0x1ef   : > { %571 = vst.msk [vmem:[%s276_s29 + $0x10] sm:$0xff] %vm568_vm1, %v768_v45  ;;  %v510_v46 = vpop.f32.mrb[1].mxu1 }
 0x1f0   : > { %569 = vst.msk [vmem:[%s276_s29] sm:$0xff] %vm568_vm1, %v510_v46  ;;  %v769_v47 = vpop.f32.mrb[2].mxu1 }
 0x1f1   : > { %572 = vst.msk [vmem:[%s276_s29 + $0x18] sm:$0xff] %vm568_vm1, %v769_v47  ;;  %v513_v48 = vpop.f32.mrb[3].mxu1 }
 0x1f2   : > { %570 = vst.msk [vmem:[%s276_s29 + $0x8] sm:$0xff] %vm568_vm1, %v513_v48 }
 0x1f6   : > { %v772_v49 = vpop.f32.mrb[4].mxu1 }
 0x1f7   : > { %575 = vst.msk [vmem:[%s276_s29 + $0x30] sm:$0xff] %vm568_vm1, %v772_v49  ;;  %v526_v50 = vpop.f32.mrb[5].mxu1 }
 0x1f8   : > { %573 = vst.msk [vmem:[%s276_s29 + $0x20] sm:$0xff] %vm568_vm1, %v526_v50  ;;  %v773_v51 = vpop.f32.mrb[6].mxu1 }
 0x1f9   : > { %576 = vst.msk [vmem:[%s276_s29 + $0x38] sm:$0xff] %vm568_vm1, %v773_v51  ;;  %v529_v52 = vpop.f32.mrb[7].mxu1 }
 0x1fa   : > { %574 = vst.msk [vmem:[%s276_s29 + $0x28] sm:$0xff] %vm568_vm1, %v529_v52 }
 0x1fb PF: > { %s13_s14 = sadd.s32 1, %s844_s14   ;;  %s922_s12 = smov %s840_s13 }
 0x1fc   : > { %p10_p5 = scmp.ge.s32.totalorder %s13_s14, 6   ;;  %s923_s13 = smov %s925_s15 }
 0x1fe   :  { %12 = sbr.rel (!%p10_p5) target bundleno = 2 (0x2), region = 76 }

// kernel: self_attention_forward.5
= control target key start
LH: loop header
LB: loop body
LE: loop exit
PB: predicated region body
PF: predicated region fallthrough
CT: control target
= control target key end

     0   :  { %s689_s9 = smov 0   ;;  %s691_s10 = smov 0   ;;  %s750_s0 = inlined_call_operand.vmem [shape: bf16[4,64,128], index: 0, kind: input, shape index: {}, may-alias: {0,1}]   ;;  %s751_s1 = inlined_call_operand.vmem [shape: bf16[4,64,128], index: 1, kind: input, shape index: {}, may-alias: {0,1}]   ;;  %s752_s2 = inlined_call_operand.vmem [shape: f32[4,1,64], index: 2, kind: output, shape index: {}]  }
   0x1   :  { %s693_s11 = smov 0  }
   0x2 LB: > { %s31_s12 = sadd.s32 1, %s666_s10  ;;  %p545_p0 = scmp.ge.s32.totalorder %s670_s11, 1  ;;  %s670_s11 = sphi %s693_s11, %s12_s11   ;;  %s666_s10 = sphi %s691_s10, %s754_s10   ;;  %s662_s9 = sphi %s689_s9, %s753_s9  }
   0x3   : > { %p33_p1 = scmp.ge.s32.totalorder %s31_s12, 4  ;;  %p157_p2 = scmp.lt.s32.totalorder %s670_s11, 5 }
   0x5   : > { %s756_s12 = smov (%p33_p1, %s31_s12), 0  ;;  %p158_p3 = pnand %p545_p0, %p157_p2 }
   0x6   : > { %p194_p4 = scmp.lt.s32.totalorder (!%p158_p3), %s662_s9, 3  ;;  %vm224_vm0 = vcmask (!%p158_p3), 516096   ;;  %v672_v8 = vmov (!%p158_p3), -inf   ;;  %v673_v9 = vmov (!%p158_p3), 0.0   ;;  %vm357_vm1 = vcmask (!%p158_p3), 523264  }
   0x7   : > { %161 = sbr.rel (%p158_p3) target bundleno = 357 (0x165), region = 28  ;;  %225 = vst.msk [vmem:[#allocation2] sm:$0x1] (!%p158_p3), %vm224_vm0, %v672_v8  ;;  %226 = vst.msk [vmem:[#allocation3] sm:$0x1] (!%p158_p3), %vm224_vm0, %v673_v9  ;;  %v386_v35 = vlaneseq (!%p158_p3) }
   0x9   : > { %v387_v38 = vshrl.u32 (!%p158_p3), %v386_v35, 7 }
   0xb   : > { %v388_v42 = vsub.s32 (!%p158_p3), 0, %v387_v38 }
   0xe   : > { %s758_s9 = smov (!%p194_p4, %s662_s9), 3  ;;  %v356_v40 = vld [vmem:[#allocation2] sm:$0x1] }
   0xf   : > { %s560_s13 = sshll.u32 %s758_s9, 5  ;;  %s218_s22 = scalar_lea.vmem %s752_s2, %s758_s9 }
  0x10   : > { %s211_s16 = scalar_lea.vmem %s751_s1, %s560_s13  ;;  %s201_s19 = scalar_lea.vmem %s750_s0, %s560_s13 }
  0x11   : > { %v620_v0 = vld [vmem:[%s211_s16] sm:$0xff]   ;;  %v621_v1 = vld [vmem:[%s211_s16 + $0x8] sm:$0xff]   ;;  %v625_v3 = vld [vmem:[%s201_s19 + $0x10] sm:$0xff]  }
  0x12   : > { %570 = vmatprep.subr.bf16.mxu0 %v620_v0  ;;  %586 = vmatprep.subr.bf16.mxu1 %v620_v0  ;;  %v624_v2 = vld [vmem:[%s201_s19] sm:$0xff]   ;;  %v622_v4 = vld [vmem:[%s211_s16 + $0x10] sm:$0xff]   ;;  %v623_v5 = vld [vmem:[%s211_s16 + $0x18] sm:$0xff]  }
  0x13   : > { %571 = vmatpush3.bf16.xpose.msra.mxu0 %v620_v0  ;;  %590 = vmatpush3.bf16.xpose.msra.mxu1 %v620_v0  ;;  %v626_v6 = vld [vmem:[%s201_s19 + $0x8] sm:$0xff]   ;;  %v627_v7 = vld [vmem:[%s201_s19 + $0x18] sm:$0xff]  }
  0x14   : > { %572 = vmatprep.subr.bf16.mxu0 %v621_v1  ;;  %587 = vmatprep.subr.bf16.mxu1 %v621_v1 }
  0x15   : > { %578 = vmatprep.mubr.bf16.mxu0 %v624_v2  ;;  %582 = vmatprep.mubr.bf16.mxu1 %v625_v3 }
  0x1b   : > { %573 = vmatpush3.bf16.xpose.msra.mxu0 %v621_v1  ;;  %591 = vmatpush3.bf16.xpose.msra.mxu1 %v621_v1 }
  0x1c   : > { %574 = vmatprep.subr.bf16.mxu0 %v622_v4  ;;  %588 = vmatprep.subr.bf16.mxu1 %v622_v4 }
  0x23   : > { %575 = vmatpush3.bf16.xpose.msra.mxu0 %v622_v4  ;;  %592 = vmatpush3.bf16.xpose.msra.mxu1 %v622_v4 }
  0x24   : > { %576 = vmatprep.subr.bf16.mxu0 %v623_v5  ;;  %589 = vmatprep.subr.bf16.mxu1 %v623_v5 }
  0x2b   : > { %577 = vmatpush3.bf16.xpose.msra.mxu0 %v623_v5  ;;  %593 = vmatpush3.bf16.xpose.msra.mxu1 %v623_v5 }
  0x32   : > { %579 = vmatmul.mubr.bf16.vlgmr.msra.gmra.mrb[0].mxu0 %v626_v6  ;;  %583 = vmatmul.mubr.bf16.vlgmr.msra.gmra.mrb[0].mxu1 %v627_v7 }
 0x105   : > { %v580_v10 = vpop.f32.mrb[0].mxu0  ;;  %v584_v11 = vpop.f32.mrb[0].mxu1 }
 0x106   : > { %v360_v12 = vsel %vm357_vm1, %v580_v10, -inf  ;;  %v366_v13 = vsel %vm357_vm1, %v584_v11, -inf  ;;  %v325_v14 = vpop.f32.mrb[1].mxu0  ;;  %v341_v15 = vpop.f32.mrb[1].mxu1 }
 0x107   : > { %v367_v16 = vmax.f32 %v360_v12, %v366_v13  ;;  %v358_v17 = vsel %vm357_vm1, %v325_v14, -inf  ;;  %v362_v18 = vsel %vm357_vm1, %v341_v15, -inf  ;;  %v581_v19 = vpop.f32.mrb[2].mxu0  ;;  %v585_v20 = vpop.f32.mrb[2].mxu1 }
 0x108   : > { %v363_v21 = vmax.f32 %v358_v17, %v362_v18  ;;  %v361_v22 = vsel %vm357_vm1, %v581_v19, -inf  ;;  %v368_v23 = vsel %vm357_vm1, %v585_v20, -inf  ;;  %v328_v24 = vpop.f32.mrb[3].mxu0  ;;  %v344_v25 = vpop.f32.mrb[3].mxu1 }
 0x109   : > { %v369_v26 = vmax.f32 %v361_v22, %v368_v23  ;;  %v359_v27 = vsel %vm357_vm1, %v328_v24, -inf  ;;  %v364_v28 = vsel %vm357_vm1, %v344_v25, -inf }
 0x10a   : > { %v365_v29 = vmax.f32 %v359_v27, %v364_v28  ;;  %v383_v27 = vld [vmem:[#allocation3] sm:$0x1] }
 0x10b   : > { %v371_v30 = vmax.f32 %v367_v16, %v369_v26 }
 0x10c   : > { %v370_v31 = vmax.f32 %v363_v21, %v365_v29 }
 0x10e   : > { %v372_v32 = vmax.f32 %v370_v31, %v371_v30 }
 0x110   : > { %v373_v33 = vrot.slane %v372_v32, 4 }
 0x112   : > { %v374_v34 = vmax.f32 %v372_v32, %v373_v33 }
 0x114   : > { %v375_v36 = vrot.slane %v374_v34, 2 }
 0x116   : > { %v376_v37 = vmax.f32 %v374_v34, %v375_v36 }
 0x118   : > { %v377_v39 = vrot.slane %v376_v37, 1 }
 0x11a   : > { %v378_v41 = vmax.f32 %v376_v37, %v377_v39 }
 0x11c   : > { %v379_v43 = vmax.f32 %v356_v40, %v378_v41 }
 0x11e   : > { %v389_v44 = vrot.slane %v379_v43, %v388_v42  ;;  %439 = vst.msk [vmem:[#allocation2] sm:$0x1] %vm224_vm0, %v379_v43  ;;  %v380_v7 = vsub.f32 %v356_v40, %v379_v43 }
 0x120   : > { %v391_v45 = vsub.f32 %v325_v14, %v389_v44  ;;  %v392_v46 = vsub.f32 %v328_v24, %v389_v44  ;;  %v393_v47 = vsub.f32 %v580_v10, %v389_v44  ;;  %v394_v48 = vsub.f32 %v581_v19, %v389_v44 }
 0x121   : > { %v395_v49 = vsub.f32 %v341_v15, %v389_v44  ;;  %v396_v50 = vsub.f32 %v344_v25, %v389_v44  ;;  %v397_v51 = vsub.f32 %v584_v11, %v389_v44  ;;  %v398_v52 = vsub.f32 %v585_v20, %v389_v44 }
 0x122   : > { %v399_v53 = vmul.f32 1.442695, %v391_v45  ;;  %v401_v54 = vmul.f32 1.442695, %v392_v46  ;;  %v403_v55 = vmul.f32 1.442695, %v393_v47 }
 0x123   : > { %v405_v56 = vmul.f32 1.442695, %v394_v48  ;;  %v407_v57 = vmul.f32 1.442695, %v395_v49  ;;  %v409_v58 = vmul.f32 1.442695, %v396_v50 }
 0x124   : > { %628 = vpow2.f32 %v399_v53  ;;  %v411_v59 = vmul.f32 1.442695, %v397_v51  ;;  %v413_v60 = vmul.f32 1.442695, %v398_v52  ;;  %v381_v14 = vmul.f32 1.442695, %v380_v7 }
 0x125   : > { %630 = vpow2.f32 %v401_v54  ;;  %v443_v35 = vld [vmem:[#allocation2] sm:$0x1] }
 0x126   : > { %632 = vpow2.f32 %v403_v55 }
 0x127   : > { %634 = vpow2.f32 %v405_v56 }
 0x128   : > { %636 = vpow2.f32 %v407_v57 }
 0x129   : > { %638 = vpow2.f32 %v409_v58 }
 0x12a   : > { %640 = vpow2.f32 %v411_v59 }
 0x12b   : > { %642 = vpow2.f32 %v413_v60 }
 0x12c   : > { %644 = vpow2.f32 %v381_v14 }
 0x12e   : > { %v629_v61 = vpop.eup %628 }
 0x12f   : > { %v631_v62 = vpop.eup %630  ;;  %v415_v63 = vsel %vm357_vm1, %v629_v61, 0.0 }
 0x130   : > { %v633_v0 = vpop.eup %632  ;;  %v416_v1 = vsel %vm357_vm1, %v631_v62, 0.0 }
 0x131   : > { %v635_v2 = vpop.eup %634  ;;  %v417_v3 = vadd.f32 %v416_v1, %v415_v63  ;;  %v418_v4 = vsel %vm357_vm1, %v633_v0, 0.0 }
 0x132   : > { %v637_v5 = vpop.eup %636  ;;  %v420_v8 = vsel %vm357_vm1, %v635_v2, 0.0 }
 0x133   : > { %v419_v6 = vadd.f32 %v418_v4, %v417_v3  ;;  %v639_v9 = vpop.eup %638  ;;  %v422_v11 = vsel %vm357_vm1, %v637_v5, 0.0 }
 0x134   : > { %v641_v12 = vpop.eup %640  ;;  %v424_v15 = vsel %vm357_vm1, %v639_v9, 0.0 }
 0x135   : > { %v421_v10 = vadd.f32 %v420_v8, %v419_v6  ;;  %v643_v16 = vpop.eup %642  ;;  %v426_v18 = vsel %vm357_vm1, %v641_v12, 0.0 }
 0x136   : > { %v428_v20 = vsel %vm357_vm1, %v643_v16, 0.0  ;;  %v645_v26 = vpop.eup %644 }
 0x137   : > { %v423_v13 = vadd.f32 %v422_v11, %v421_v10  ;;  %v384_v29 = vmul.f32 %v645_v26, %v383_v27 }
 0x139   : > { %v425_v17 = vadd.f32 %v424_v15, %v423_v13 }
 0x13b   : > { %v427_v19 = vadd.f32 %v426_v18, %v425_v17 }
 0x13d   : > { %v429_v21 = vadd.f32 %v428_v20, %v427_v19 }
 0x13f   : > { %v430_v22 = vrot.slane %v429_v21, 4 }
 0x141   : > { %v431_v23 = vadd.f32 %v430_v22, %v429_v21 }
 0x143   : > { %v432_v24 = vrot.slane %v431_v23, 2 }
 0x145   : > { %v433_v25 = vadd.f32 %v432_v24, %v431_v23 }
 0x147   : > { %v434_v28 = vrot.slane %v433_v25, 1 }
 0x149   : > { %v435_v30 = vadd.f32 %v434_v28, %v433_v25 }
 0x14b   : > { %v436_v31 = vadd.f32 %v435_v30, %v384_v29 }
 0x14d   : > { %438 = vst.msk [vmem:[#allocation3] sm:$0x1] %vm224_vm0, %v436_v31 }
 0x154   : > { %v444_v32 = vld [vmem:[#allocation3] sm:$0x1] }
 0x155   : > { %646 = vlog2.f32 %v444_v32 }
 0x15f   : > { %v647_v33 = vpop.eup %646 }
 0x160   : > { %v446_v34 = vmul.f32 0.6931472, %v647_v33 }
 0x162   : > { %v447_v36 = vadd.f32 %v446_v34, %v443_v35 }
 0x164   : > { %448 = vst.msk [vmem:[%s218_s22] sm:$0x1] %vm224_vm0, %v447_v36 }
 0x165 PF: > { %s12_s11 = sadd.s32 1, %s670_s11   ;;  %s753_s9 = smov %s666_s10 }
 0x166   : > { %p9_p5 = scmp.ge.s32.totalorder %s12_s11, 6   ;;  %s754_s10 = smov %s756_s12 }
 0x168   :  { %11 = sbr.rel (!%p9_p5) target bundleno = 2 (0x2), region = 69 }

// kernel: self_attention_forward.7
= control target key start
LH: loop header
LB: loop body
LE: loop exit
PB: predicated region body
PF: predicated region fallthrough
CT: control target
= control target key end

     0   :  { %s1039_s13 = smov 0   ;;  %s1041_s14 = smov 0   ;;  %s1121_s0 = inlined_call_operand.vmem [shape: f32[2,8,64], index: 0, kind: input, shape index: {}]   ;;  %s1122_s1 = inlined_call_operand.vmem [shape: f32[4,8,64], index: 1, kind: input, shape index: {}, may-alias: {1,2}]   ;;  %s1123_s2 = inlined_call_operand.vmem [shape: f32[4,8,64], index: 2, kind: input, shape index: {}, may-alias: {1,2}]   ;;  %s1124_s3 = inlined_call_operand.vmem [shape: f32[8,8], index: 3, kind: input, shape index: {}]   ;;  %s1125_s4 = inlined_call_operand.vmem [shape: f32[8,1], index: 4, kind: input, shape index: {}]   ;;  %s1126_s5 = inlined_call_operand.vmem [shape: f32[8,8], index: 5, kind: input, shape index: {}]   ;;  %s1127_s6 = inlined_call_operand.vmem [shape: f32[8,1], index: 6, kind: input, shape index: {}]   ;;  %s1128_s7 = inlined_call_operand.vmem [shape: f32[8,8], index: 7, kind: input, shape index: {}]   ;;  %s1129_s8 = inlined_call_operand.vmem [shape: f32[8,8], index: 8, kind: input, shape index: {}]   ;;  %s1130_s9 = inlined_call_operand.vmem [shape: f32[8,1], index: 9, kind: input, shape index: {}]   ;;  %s1131_s10 = inlined_call_operand.vmem [shape: f32[2,8,64], index: 10, kind: output, shape index: {}]  }
   0x1   :  { %s1043_s15 = smov 0  }
   0x2 LB: > { %s32_s16 = sadd.s32 1, %s975_s14  ;;  %p889_p0 = scmp.ge.s32.totalorder %s979_s15, 1  ;;  %s979_s15 = sphi %s1043_s15, %s20_s15   ;;  %s975_s14 = sphi %s1041_s14, %s1133_s14   ;;  %s971_s13 = sphi %s1039_s13, %s1132_s13  }
   0x3   : > { %p34_p1 = scmp.ge.s32.totalorder %s32_s16, 2  ;;  %p362_p2 = scmp.lt.s32.totalorder %s979_s15, 3 }
   0x5   : > { %s1135_s16 = smov (%p34_p1, %s32_s16), 0  ;;  %p363_p3 = pnand %p889_p0, %p362_p2 }
   0x6   : > { %p419_p4 = scmp.lt.s32.totalorder (!%p363_p3), %s971_s13, 1  ;;  %p426_p5 = scmp.lt.s32.totalorder (!%p363_p3), %s971_s13, 3  ;;  %v981_v0 = vmov (!%p363_p3), 0.0   ;;  %vm982_vm0 = vmmov (!%p363_p3), 0   ;;  %v453_v1 = vld [vmem:[%s1125_s4] sm:$0xff] (!%p363_p3)  ;;  %v983_v2 = vmov (!%p363_p3), 0  }
   0x7   : > { %366 = sbr.rel (%p363_p3) target bundleno = 463 (0x1cf), region = 60  ;;  %908 = vmatprep.subr.mxu0 (!%p363_p3), %v981_v0  ;;  %910 = vmatprep.mubr.msk.f32.mxu0 (!%p363_p3), %vm982_vm0, %v981_v0  ;;  %s433_s17 = sadd.s32 (!%p363_p3), 2, %s971_s13  ;;  %v539_v3 = vld [vmem:[%s1127_s6] sm:$0xff] (!%p363_p3)  ;;  %vm459_vm1 = vcmask (!%p363_p3), 64512   ;;  %vm779_vm4 = vcmask (!%p363_p3), 523264  }
   0x8   : > { %913 = vmatprep.subr.mxu1 (!%p363_p3), %v981_v0  ;;  %915 = vmatprep.mubr.msk.f32.mxu1 (!%p363_p3), %vm982_vm0, %v981_v0  ;;  %p434_p6 = scmp.lt.s32.totalorder (!%p363_p3), %s433_s17, 3  ;;  %v450_v7 = vld [vmem:[%s1124_s3] sm:$0xff] (!%p363_p3) }
   0x9   : > { %955 = vset.pattern.permute.xlu0 (!%p363_p3), %v983_v2  ;;  %956 = vset.pattern.permute.xlu1 (!%p363_p3), %v983_v2  ;;  %v536_v10 = vld [vmem:[%s1126_s5] sm:$0xff] (!%p363_p3) }
   0xa   : > { %456 = vperm.xlu0 (!%p363_p3), %955, %v453_v1   ;;  %v769_v11 = vld [vmem:[%s1130_s9] sm:$0xff] (!%p363_p3) }
   0xb   : > { %772 = vperm.xlu1 (!%p363_p3), %956, %v769_v11   ;;  %v621_v19 = vld [vmem:[%s1128_s7] sm:$0xff] (!%p363_p3) }
   0xc   : > { %v622_v24 = vld [vmem:[%s1129_s8] sm:$0xff] (!%p363_p3) }
   0xe   : > { %s1067_s20 = scalar_select %p419_p4, %s971_s13, 1  ;;  %542 = vperm.xlu0 %955, %v539_v3  }
   0xf   : > { %s1137_s13 = smov (!%p426_p5, %s971_s13), 3  ;;  %s1139_s17 = smov (!%p434_p6, %s433_s17), 3 }
  0x10   : > { %s890_s21 = sshll.u32 %s1067_s20, 3  ;;  %s891_s25 = sshll.u32 %s1137_s13, 3 }
  0x11   : > { %s425_s24 = scalar_lea.vmem %s1121_s0, %s890_s21  ;;  %s432_s30 = scalar_lea.vmem %s1122_s1, %s891_s25 }
  0x12   : > { %v449_v4 = vld [vmem:[%s425_s24] sm:$0xff]  ;;  %s892_s18 = sshll.u32 %s1139_s17, 3  ;;  %s448_s12 = scalar_lea.vmem %s1131_s10, %s890_s21 }
  0x13   : > { %v451_v5 = vld [vmem:[%s432_s30] sm:$0xff]  ;;  %s440_s22 = scalar_lea.vmem %s1123_s2, %s892_s18 }
  0x14   : > { %v452_v6 = vadd.f32 %v451_v5, %v449_v4  ;;  %v537_v8 = vld [vmem:[%s440_s22] sm:$0xff] }
  0x15   : > { %v538_v9 = vadd.f32 %v537_v8, %v449_v4 }
  0x16   : > { %909 = vmatpush3.msra.mxu0 %v452_v6 }
  0x17   : > { %911 = vmatmul.mubr.msk.f32.vlgmr.msra.gmra.mrb[0].mxu0 %vm459_vm1, %v450_v7  ;;  %918 = vmatprep.subr.mxu0 %v981_v0 }
  0x18   : > { %920 = vmatprep.mubr.msk.f32.mxu0 %vm982_vm0, %v981_v0  ;;  %914 = vmatpush3.msra.mxu1 %v538_v9 }
  0x19   : > { %916 = vmatmul.mubr.msk.f32.vlgmr.msra.gmra.mrb[0].mxu1 %vm459_vm1, %v536_v10  ;;  %923 = vmatprep.subr.mxu1 %v981_v0 }
  0x1a   : > { %925 = vmatprep.mubr.msk.f32.mxu1 %vm982_vm0, %v981_v0 }
  0x89   : > { %v457_v12 = vpop.permute.xlu0 %456 }
  0x8a   : > { %v773_v29 = vpop.permute.xlu1 %772 }
  0x8d   : > { %v543_v17 = vpop.permute.xlu0 %542 }
  0xea   : > { %v529_v13 = vpop.f32.mrb[0].mxu0 }
  0xeb   : > { %v530_v14 = vadd.f32 %v529_v13, %v457_v12  ;;  %v912_v15 = vpop.f32.mrb[1].mxu0 }
  0xec   : > { %v614_v18 = vpop.f32.mrb[0].mxu1 }
  0xed   : > { %vm533_vm2 = vcmp.gt.f32.partialorder %v530_v14, 0.0  ;;  %v534_v16 = vmul.f32 0.01, %v530_v14  ;;  %v615_v20 = vadd.f32 %v614_v18, %v543_v17  ;;  %v917_v21 = vpop.f32.mrb[1].mxu1 }
  0xef   : > { %v535_v22 = vsel %vm533_vm2, %v530_v14, %v534_v16  ;;  %vm618_vm3 = vcmp.gt.f32.partialorder %v615_v20, 0.0  ;;  %v619_v23 = vmul.f32 0.01, %v615_v20 }
  0xf0   : > { %924 = vmatpush3.msra.mxu1 %v535_v22 }
  0xf1   : > { %926 = vmatmul.mubr.msk.f32.vlgmr.msra.gmra.mrb[2].mxu1 %vm459_vm1, %v621_v19  ;;  %v620_v25 = vsel %vm618_vm3, %v615_v20, %v619_v23 }
  0xf2   : > { %919 = vmatpush3.msra.mxu0 %v620_v25 }
  0xf3   : > { %921 = vmatmul.mubr.msk.f32.vlgmr.msra.gmra.mrb[2].mxu0 %vm459_vm1, %v622_v24 }
 0x1c4   : > { %v765_v26 = vpop.f32.mrb[2].mxu1 }
 0x1c5   : > { %v927_v27 = vpop.f32.mrb[3].mxu1 }
 0x1c6   : > { %v692_v28 = vpop.f32.mrb[2].mxu0 }
 0x1c7   : > { %v766_v30 = vadd.f32 %v765_v26, %v692_v28  ;;  %v922_v31 = vpop.f32.mrb[3].mxu0 }
 0x1c9   : > { %v775_v32 = vadd.f32 %v773_v29, %v766_v30 }
 0x1cb   : > { %vm776_vm5 = vcmp.gt.f32.partialorder %v775_v32, 0.0  ;;  %v777_v33 = vmul.f32 0.01, %v775_v32 }
 0x1cd   : > { %v778_v34 = vsel %vm776_vm5, %v775_v32, %v777_v33 }
 0x1ce   : > { %780 = vst.msk [vmem:[%s448_s12] sm:$0xff] %vm779_vm4, %v778_v34 }
 0x1cf PF: > { %s20_s15 = sadd.s32 1, %s979_s15   ;;  %s1132_s13 = smov %s975_s14 }
 0x1d0   : > { %p17_p7 = scmp.ge.s32.totalorder %s20_s15, 4   ;;  %s1133_s14 = smov %s1135_s16 }
 0x1d2   :  { %19 = sbr.rel (!%p17_p7) target bundleno = 2 (0x2), region = 96 }

</bundles_post_ra>
